<compile_context>
chip_gen: v7x
topology: tpu7x:2x2x1
jax: 0.10.0
libtpu: 0.0.40
codegen_flags: <defaults>
</compile_context>

<pallas_src>
import functools
import math

import jax
import jax.numpy as jnp
from jax.experimental import pallas as pl
from jax.experimental.pallas import tpu as pltpu


_TARGET_TILE_BYTES = 2 * 1024 * 1024   # ~2 MiB per output tile (store-bound regime)
_MIN_LANES = 256                       # pack positions until last dim >= 256 (mult of 128)


def _packing_factor(dim: int) -> int:
    """Positions packed per lane-row so the output last dim is a dense multiple of 128."""
    k = 128 // math.gcd(dim, 128)
    while k * dim < _MIN_LANES:
        k *= 2
    return k


def _rope_kernel(freq_ref, sinb_ref, cosb_ref, sin_ref, cos_ref, *, delta_stride: int):
    # freq_ref : (1, lanes)         interleave-duplicated, k-tiled inv_freq (VMEM-resident)
    # sinb_ref : (tile_rows, lanes) sin of base angles for local rows [0, tile_rows)
    # cosb_ref : (tile_rows, lanes) cos of base angles
    # sin_ref / cos_ref : (tile_rows, lanes) output tiles
    #
    # global_angle = base_angle + delta,  delta = program_id * tile_rows * k * inv_freq.
    delta_pos = (pl.program_id(0) * delta_stride).astype(jnp.float32)   # scalar
    d = delta_pos * freq_ref[...]                                       # (1, lanes)
    s_d = jnp.sin(d)                                                    # one row of
    c_d = jnp.cos(d)                                                    # transcendentals
    s_b = sinb_ref[...]
    c_b = cosb_ref[...]
    # Angle-addition identities (6 full-tile VPU ops, no full-tile sin/cos).
    sin_ref[...] = s_b * c_d + c_b * s_d
    cos_ref[...] = c_b * c_d - s_b * s_d


class FixedPositionalEmbedding:
    """JAX/Pallas port of the PyTorch FixedPositionalEmbedding module."""

    def __init__(self, dim: int):
        assert dim % 2 == 0, "dim must be even"
        self.dim = dim
        self.k = _packing_factor(dim)
        lanes = self.k * dim

        # Deterministic "buffer", exactly as in the torch __init__.
        inv_freq = 1.0 / (10000.0 ** (jnp.arange(0, dim, 2, dtype=jnp.float32) / dim))
        inv_freq_dup = jnp.repeat(inv_freq, 2)                    # (dim,) [f0,f0,f1,f1,...]
        self.freq_row = jnp.tile(inv_freq_dup, self.k)[None, :]   # (1, lanes)
        # Position offset within a packed row: [0]*dim, [1]*dim, ..., [k-1]*dim
        self.pos_off = jnp.repeat(jnp.arange(self.k, dtype=jnp.float32), dim)  # (lanes,)
        self._base_cache = {}

    def _base_tiles(self, tile_rows: int):
        """sin/cos of base angles for local packed rows [0, tile_rows)."""
        cached = self._base_cache.get(tile_rows)
        if cached is not None:
            return cached
        row = jnp.arange(tile_rows, dtype=jnp.float32)[:, None]          # (tile_rows, 1)
        base_angle = (row * self.k + self.pos_off[None, :]) * self.freq_row
        tiles = (jnp.sin(base_angle), jnp.cos(base_angle))               # (tile_rows, lanes)
        self._base_cache[tile_rows] = tiles
        return tiles

    def __call__(self, n: int):
        dim, k = self.dim, self.k
        lanes = k * dim

        # Pad n up to a multiple of the packing factor; extra rows are sliced off.
        n_pad = pl.cdiv(n, k) * k
        rows = n_pad // k

        # Tile rows: multiple of 8 (or full extent), ~2 MiB per output tile, but
        # split into >=2 grid steps whenever possible so v7x's second TensorCore
        # is used (no-op on single-TC v5e/v6e).
        max_rows_per_tile = max(8, (_TARGET_TILE_BYTES // (lanes * 4)) // 8 * 8)
        if rows >= 16:
            half_rows = ((rows + 1) // 2 + 7) // 8 * 8
            max_rows_per_tile = min(max_rows_per_tile, half_rows)
        tile_rows = min(rows, max_rows_per_tile)
        grid = (pl.cdiv(rows, tile_rows),)

        sin_base, cos_base = self._base_tiles(tile_rows)

        # Explicit VMEM budget: 2 outputs x 2 pipeline buffers x tile, plus the
        # resident inputs (freq row + 2 base tiles, x2 buffers), plus headroom.
        tile_out_bytes = tile_rows * lanes * 4
        vmem_bytes = 2 * 2 * tile_out_bytes
        vmem_bytes += 2 * (2 * tile_rows + 1) * lanes * 4
        vmem_bytes += 2 << 20
        vmem_bytes = min(vmem_bytes, 64 << 20)

        sin_p, cos_p = pl.pallas_call(
            functools.partial(_rope_kernel, delta_stride=tile_rows * k),
            out_shape=(
                jax.ShapeDtypeStruct((rows, lanes), jnp.float32),
                jax.ShapeDtypeStruct((rows, lanes), jnp.float32),
            ),
            grid=grid,
            in_specs=[
                pl.BlockSpec((1, lanes), lambda i: (0, 0)),          # freq row (resident)
                pl.BlockSpec((tile_rows, lanes), lambda i: (0, 0)),  # sin base (resident)
                pl.BlockSpec((tile_rows, lanes), lambda i: (0, 0)),  # cos base (resident)
            ],
            out_specs=(
                pl.BlockSpec((tile_rows, lanes), lambda i: (i, 0)),
                pl.BlockSpec((tile_rows, lanes), lambda i: (i, 0)),
            ),
            compiler_params=pltpu.CompilerParams(
                dimension_semantics=("parallel",),
                vmem_limit_bytes=vmem_bytes,
            ),
        )(self.freq_row, sin_base, cos_base)

        # (rows, k*dim) is a row-major view of (n_pad, dim): reshape is free.
        sin = sin_p.reshape(n_pad, dim)[:n].reshape(1, n, dim)
        cos = cos_p.reshape(n_pad, dim)[:n].reshape(1, n, dim)
        return [sin, cos]
        # TODO(synk): outputs stay f32 to match the torch reference; cast to bf16
        # here if downstream RoPE application tolerates it (halves HBM writes).


def _reference(n: int, dim: int):
    inv_freq = 1.0 / (10000.0 ** (jnp.arange(0, dim, 2, dtype=jnp.float32) / dim))
    seq = jnp.arange(n, dtype=jnp.float32)
    freqs = jnp.einsum("i,j->ij", seq, inv_freq)          # (n, dim//2)
    freqs = jnp.repeat(freqs, 2, axis=-1)[None]           # (1, n, dim)
    return [jnp.sin(freqs), jnp.cos(freqs)]


if __name__ == "__main__":
    # small shapes: seq n=8, hidden dim=32
    n, dim = 8, 32
    # PRNG key unused for parameters (they are deterministic by construction),
    # but created per the harness convention.
    _ = jax.random.PRNGKey(0)

    emb = FixedPositionalEmbedding(dim)
    sin_v, cos_v = emb(n)
    jax.block_until_ready(sin_v)
    jax.block_until_ready(cos_v)

    sin_ref, cos_ref = _reference(n, dim)
    assert sin_v.shape == (1, n, dim) and cos_v.shape == (1, n, dim)
    assert jnp.allclose(sin_v, sin_ref, atol=1e-5, rtol=1e-5)
    assert jnp.allclose(cos_v, cos_ref, atol=1e-5, rtol=1e-5)

    # Secondary check: n large enough to exercise >1 grid step (non-zero delta
    # angle in the angle-addition path) and a partial trailing tile.
    n2 = 300
    sin2, cos2 = emb(n2)
    jax.block_until_ready(sin2)
    sin2_ref, cos2_ref = _reference(n2, dim)
    assert jnp.allclose(sin2, sin2_ref, atol=1e-5, rtol=1e-5)
    assert jnp.allclose(cos2, cos2_ref, atol=1e-5, rtol=1e-5)

    print("KERNEL_OK")
</pallas_src>

<mosaic_0001>
module attributes {stable_mosaic.version = 11 : i64} {
  func.func @_rope_kernel(%arg0: i32, %arg1: memref<1x256xf32, #tpu.memory_space<vmem>>, %arg2: memref<1x256xf32, #tpu.memory_space<vmem>>, %arg3: memref<1x256xf32, #tpu.memory_space<vmem>>, %arg4: memref<1x256xf32, #tpu.memory_space<vmem>>, %arg5: memref<1x256xf32, #tpu.memory_space<vmem>>) attributes {dimension_semantics = [#tpu.dimension_semantics<parallel>], iteration_bounds = array<i64: 1>, scalar_prefetch = 0 : i64, scratch_operands = 0 : i64, tpu.core_type = #tpu.core_type<tc>, window_params = [{pipeline_mode = #tpu.pipeline_mode<synchronous>, transform_indices = @transform_0, window_bounds = array<i64: 1, 256>}, {pipeline_mode = #tpu.pipeline_mode<synchronous>, transform_indices = @transform_1, window_bounds = array<i64: 1, 256>}, {pipeline_mode = #tpu.pipeline_mode<synchronous>, transform_indices = @transform_2, window_bounds = array<i64: 1, 256>}, {transform_indices = @transform_3, window_bounds = array<i64: 1, 256>}, {transform_indices = @transform_4, window_bounds = array<i64: 1, 256>}]} {
    %c8_i32 = arith.constant 8 : i32
    %0 = arith.muli %arg0, %c8_i32 : i32
    %1 = arith.sitofp %0 : i32 to f32
    %c0 = arith.constant 0 : index
    %c0_0 = arith.constant 0 : index
    %2 = vector.load %arg1[%c0, %c0_0] : memref<1x256xf32, #tpu.memory_space<vmem>>, vector<1x256xf32>
    %3 = vector.broadcast %1 : f32 to vector<1x256xf32>
    %4 = arith.mulf %3, %2 : vector<1x256xf32>
    %5 = math.sin %4 : vector<1x256xf32>
    %6 = math.cos %4 : vector<1x256xf32>
    %c0_1 = arith.constant 0 : index
    %c0_2 = arith.constant 0 : index
    %7 = vector.load %arg2[%c0_1, %c0_2] : memref<1x256xf32, #tpu.memory_space<vmem>>, vector<1x256xf32>
    %c0_3 = arith.constant 0 : index
    %c0_4 = arith.constant 0 : index
    %8 = vector.load %arg3[%c0_3, %c0_4] : memref<1x256xf32, #tpu.memory_space<vmem>>, vector<1x256xf32>
    %9 = arith.mulf %7, %6 : vector<1x256xf32>
    %10 = arith.mulf %8, %5 : vector<1x256xf32>
    %11 = arith.addf %9, %10 : vector<1x256xf32>
    %c0_5 = arith.constant 0 : index
    %c0_6 = arith.constant 0 : index
    %12 = vector.load %arg4[%c0_5, %c0_6] : memref<1x256xf32, #tpu.memory_space<vmem>>, vector<1x256xf32>
    tpu.vector_store %arg4[%c0_5, %c0_6], %11 {strides = array<i32>} : memref<1x256xf32, #tpu.memory_space<vmem>>, vector<1x256xf32>,
    %13 = arith.mulf %8, %6 : vector<1x256xf32>
    %14 = arith.mulf %7, %5 : vector<1x256xf32>
    %15 = arith.subf %13, %14 : vector<1x256xf32>
    %c0_7 = arith.constant 0 : index
    %c0_8 = arith.constant 0 : index
    %16 = vector.load %arg5[%c0_7, %c0_8] : memref<1x256xf32, #tpu.memory_space<vmem>>, vector<1x256xf32>
    tpu.vector_store %arg5[%c0_7, %c0_8], %15 {strides = array<i32>} : memref<1x256xf32, #tpu.memory_space<vmem>>, vector<1x256xf32>,
    return
  }
  func.func @transform_0(%arg0: i32) -> (i32, i32) {
    %c0_i32 = arith.constant 0 : i32
    %c0_i32_0 = arith.constant 0 : i32
    %c0_i32_1 = arith.constant 0 : i32
    return %c0_i32, %c0_i32_0 : i32, i32
  }
  func.func @transform_1(%arg0: i32) -> (i32, i32) {
    %c0_i32 = arith.constant 0 : i32
    %c0_i32_0 = arith.constant 0 : i32
    %c0_i32_1 = arith.constant 0 : i32
    return %c0_i32, %c0_i32_0 : i32, i32
  }
  func.func @transform_2(%arg0: i32) -> (i32, i32) {
    %c0_i32 = arith.constant 0 : i32
    %c0_i32_0 = arith.constant 0 : i32
    %c0_i32_1 = arith.constant 0 : i32
    return %c0_i32, %c0_i32_0 : i32, i32
  }
  func.func @transform_3(%arg0: i32) -> (i32, i32) {
    %c0_i32 = arith.constant 0 : i32
    %c0_i32_0 = arith.constant 0 : i32
    return %arg0, %c0_i32 : i32, i32
  }
  func.func @transform_4(%arg0: i32) -> (i32, i32) {
    %c0_i32 = arith.constant 0 : i32
    %c0_i32_0 = arith.constant 0 : i32
    return %arg0, %c0_i32 : i32, i32
  }
}

</mosaic_0001>

<bundles_post_ra>
// kernel: tpu_custom_call.1
= control target key start
LH: loop header
LB: loop body
LE: loop exit
PB: predicated region body
PF: predicated region fallthrough
CT: control target
= control target key end

     0   :  { %10 = vsyncpa [#allocation3], 0  ;;  %s479_s0 = inlined_call_operand.hbm [shape: f32[1,256], index: 0, kind: input, shape index: {}]   ;;  %s480_s1 = inlined_call_operand.vmem [shape: f32[1,256], index: 1, kind: input, shape index: {}]   ;;  %s481_s2 = inlined_call_operand.vmem [shape: f32[1,256], index: 2, kind: input, shape index: {}]   ;;  %s482_s3 = inlined_call_operand.hbm [shape: f32[1,256], index: 3, kind: output, shape index: {0}]   ;;  %s483_s4 = inlined_call_operand.hbm [shape: f32[1,256], index: 4, kind: output, shape index: {1}]  }
   0x1   :  { %11 = vsyncpa [#allocation4], 0 }
   0x2   :  { %12 = vsyncpa [#allocation7], 0  ;;  %s382_s15 = smov [#allocation2]   ;;  %s310_s19 = scalar_lea.hbm %s479_s0, 32 }
   0x3   :  { %s19_s16 = sshll.u32 %s382_s15, 4  ;;  %p311_p0 = scmp.ne.s32.totalorder %s479_s0, %s310_s19  ;;  %s20_s16 = int_to_ptr.vmem [resolvable:$true] %s19_s16 }
   0x4   :  { %p314_p1 = scmp.lt.u32.totalorder %s310_s19, %s479_s0 }
   0x6   :  { %p316_p2 = pnand %p314_p1, %p311_p0 }
   0x8   :  { %319 = shalt.err (!%p316_p2)
}
   0x9   :  { %s320_s24 = scalar_lea.vmem %s20_s16, 32  ;;  %p325_p4 = scmp.lt.s32.totalorder %s20_s16, %s20_s16 }
   0xa   :  { %p321_p3 = scmp.ne.s32.totalorder %s20_s16, %s320_s24  ;;  %p326_p5 = scmp.lt.s32.totalorder %s320_s24, %s320_s24 }
   0xc   :  { %p327_p6 = por %p326_p5, %p325_p4 }
   0xe   :  { %p328_p7 = pnand %p327_p6, %p321_p3 }
  0x10   :  { %331 = shalt.err (!%p328_p7)
}
  0x11   :  { %22 = dma.hbm_to_vmem [thread:$0]  %s479_s0, 32, %s20_s16, [#allocation3]  }
  0x12   :  { %376 = dma.done.wait [#allocation3], 32  }
  0x13   :  { %377 = vsyncadd [#allocation3], 4294967264  ;;  %v32_v0 = vld [vmem:[#allocation2] sm:$0x3]  ;;  %v383_v13 = vmov 683565275  }
  0x14   :  { %v428_v1 = vmul.f32 0.0, %v32_v0  ;;  %v384_v15 = vmov 2475754826   ;;  %v385_v17 = vmov 2131351028   ;;  %s389_s30 = smov [#allocation5]  }
  0x15   :  { %v386_v19 = vmov 2102212464   ;;  %v387_v21 = vmov 920167782   ;;  %v388_v28 = vmov 1326507024  }
  0x16   :  { %v38_v2 = vand.u32 2139095040, %v428_v1  ;;  %v35_v4 = vand.u32 2147483647, %v428_v1  ;;  %vm37_vm7 = vcmp.lt.s32.totalorder %v428_v1, 0  ;;  %vm127_vm15 = vweird.f32 %v428_v1  ;;  %s262_s5 = sshll.u32 %s389_s30, 4  ;;  %s390_s6 = smov [#allocation6]   ;;  %s263_s5 = int_to_ptr.vmem [resolvable:$true] %s262_s5 }
  0x17   :  { %s272_s7 = sshll.u32 %s390_s6, 4  ;;  %p337_p9 = scmp.lt.s32.totalorder %s263_s5, %s263_s5  ;;  %s273_s7 = int_to_ptr.vmem [resolvable:$true] %s272_s7 }
  0x18   :  { %v39_v3 = vshrl.u32 %v38_v2, 23  ;;  %v42_v7 = vand.u32 8388607, %v35_v4  ;;  %vm36_vm8 = vcmp.le.f32.partialorder %v35_v4, 0.7853982 }
  0x1a   :  { %v285_v5 = vadd.s32 4294967169, %v39_v3  ;;  %v43_v10 = vor.u32 8388608, %v42_v7 }
  0x1c   :  { %v45_v6 = vadd.s32 1, %v285_v5  ;;  %v83_v30 = vshll.u32 %v43_v10, 8 }
  0x1e   :  { %vm46_vm0 = vcmp.gt.s32.totalorder %v45_v6, 0 }
  0x1f   :  { %v47_v8 = vsel %vm46_vm0, %v45_v6, 0 }
  0x20   :  { %v49_v9 = vand.u32 31, %v47_v8  ;;  %v48_v11 = vshrl.u32 %v47_v8, 5 }
  0x22   :  { %v50_v12 = vsub.s32 32, %v49_v9  ;;  %v52_v14 = vshll.u32 %v383_v13, %v49_v9  ;;  %v55_v16 = vshll.u32 %v384_v15, %v49_v9  ;;  %v58_v18 = vshll.u32 %v385_v17, %v49_v9 }
  0x23   :  { %v61_v20 = vshll.u32 %v386_v19, %v49_v9  ;;  %v64_v22 = vshll.u32 %v387_v21, %v49_v9  ;;  %vm67_vm1 = vcmp.lt.s32.totalorder %v48_v11, 1  ;;  %vm70_vm2 = vcmp.lt.s32.totalorder %v48_v11, 4 }
  0x24   :  { %v51_v23 = vshrl.u32 %v383_v13, %v50_v12  ;;  %v53_v24 = vshrl.u32 %v384_v15, %v50_v12  ;;  %v56_v25 = vshrl.u32 %v385_v17, %v50_v12  ;;  %v59_v26 = vshrl.u32 %v386_v19, %v50_v12 }
  0x25   :  { %v62_v27 = vshrl.u32 %v387_v21, %v50_v12  ;;  %v65_v29 = vshrl.u32 %v388_v28, %v50_v12  ;;  %vm68_vm3 = vcmp.lt.s32.totalorder %v48_v11, 2  ;;  %vm69_vm4 = vcmp.lt.s32.totalorder %v48_v11, 3 }
  0x26   :  { %v54_v31 = vor.u32 %v53_v24, %v52_v14  ;;  %v57_v32 = vor.u32 %v56_v25, %v55_v16  ;;  %v60_v33 = vor.u32 %v59_v26, %v58_v18 }
  0x27   :  { %v63_v34 = vor.u32 %v62_v27, %v61_v20  ;;  %v66_v35 = vor.u32 %v65_v29, %v64_v22 }
  0x28   :  { %v71_v36 = vsel %vm67_vm1, %v51_v23, %v54_v31  ;;  %v72_v37 = vsel %vm70_vm2, %v60_v33, 2102212464  ;;  %v75_v38 = vsel %vm67_vm1, %v54_v31, %v57_v32  ;;  %v79_v39 = vsel %vm67_vm1, %v57_v32, %v60_v33  ;;  %v242_v31 = vld [vmem:[%s480_s1] sm:$0x3]  ;;  %s332_s1 = scalar_lea.vmem %s263_s5, 32 }
  0x29   :  { %v73_v40 = vsel %vm69_vm4, %v57_v32, %v72_v37  ;;  %v76_v41 = vsel %vm70_vm2, %v63_v34, 920167782  ;;  %v80_v42 = vsel %vm70_vm2, %v66_v35, 1326507024  ;;  %v243_v32 = vld [vmem:[%s481_s2] sm:$0x3]  ;;  %p333_p8 = scmp.ne.s32.totalorder %s263_s5, %s332_s1  ;;  %p338_p10 = scmp.lt.s32.totalorder %s332_s1, %s332_s1 }
  0x2a   :  { %v77_v43 = vsel %vm69_vm4, %v60_v33, %v76_v41  ;;  %v81_v44 = vsel %vm69_vm4, %v63_v34, %v80_v42  ;;  %v74_v45 = vsel %vm68_vm3, %v71_v36, %v73_v40  ;;  %v247_v33 = vlaneseq }
  0x2b   :  { %v78_v46 = vsel %vm68_vm3, %v75_v38, %v77_v43  ;;  %v82_v47 = vsel %vm68_vm3, %v79_v39, %v81_v44  ;;  %v90_v52 = vmul.u32 %v83_v30, %v74_v45  ;;  %p339_p11 = por %p338_p10, %p337_p9 }
  0x2c   :  { %v434_v48 = vmul.u32.u64.low %v83_v30, %v82_v47  ;;  %v435_v49 = vmul.u32.u64.high %v83_v30, %v82_v47, %v434_v48  ;;  %v437_v50 = vmul.u32.u64.low %v83_v30, %v78_v46  ;;  %v438_v51 = vmul.u32.u64.high %v83_v30, %v78_v46, %v437_v50 }
  0x2d   :  { %vm249_vm0 = vcmp.lt.s32.totalorder %v247_v33, 256  ;;  %p340_p12 = pnand %p339_p11, %p333_p8 }
  0x2e   :  { %vm92_vm5 = vc.u32 %v435_v49, %v437_v50  ;;  %v93_v53 = vadd.s32 1, %v438_v51  ;;  %v91_v0 = vadd.s32 %v437_v50, %v435_v49 }
  0x30   :  { %v94_v54 = vsel %vm92_vm5, %v93_v53, %v438_v51 }
  0x31   :  { %v95_v55 = vadd.s32 %v94_v54, %v90_v52 }
  0x33   :  { %v96_v56 = vadd.s32 536870912, %v95_v55 }
  0x35   :  { %v97_v57 = vshrl.u32 %v96_v56, 30 }
  0x37   :  { %v98_v58 = vshll.u32 %v97_v57, 30  ;;  %v121_v14 = vsub.s32 4, %v97_v57 }
  0x39   :  { %v99_v59 = vsub.s32 %v95_v55, %v98_v58  ;;  %v122_v17 = vsel %vm37_vm7, %v121_v14, %v97_v57 }
  0x3a   :  { %v124_v20 = vsel %vm36_vm8, 0, %v122_v17 }
  0x3b   :  { %v101_v60 = vsub.s32 0, %v99_v59  ;;  %v128_v21 = vadd.s32 3, %v124_v20  ;;  %v232_v23 = vand.u32 3, %v124_v20 }
  0x3d   :  { %v286_v61 = vmin.u32 %v101_v60, %v99_v59  ;;  %v129_v22 = vand.u32 3, %v128_v21  ;;  %vm237_vm10 = vcmp.eq.s32.totalorder %v232_v23, 2  ;;  %vm234_vm12 = vcmp.eq.s32.totalorder %v232_v23, 0 }
  0x3e   :  { %vm233_vm14 = vcmp.lt.s32.totalorder %v232_v23, 2 }
  0x3f   :  { %v103_v62 = vclz %v286_v61  ;;  %vm134_vm9 = vcmp.eq.s32.totalorder %v129_v22, 2  ;;  %vm131_vm11 = vcmp.eq.s32.totalorder %v129_v22, 0  ;;  %vm130_vm13 = vcmp.lt.s32.totalorder %v129_v22, 2 }
  0x41   :  { %v287_v63 = vadd.s32 4294967294, %v103_v62 }
  0x43   :  { %vm288_vm6 = vcmp.lt.s32.totalorder %v287_v63, 0 }
  0x44   :  { %v106_v2 = vsel %vm288_vm6, 0, %v287_v63 }
  0x45   :  { %v107_v3 = vsub.s32 32, %v106_v2  ;;  %v108_v5 = vshll.u32 %v99_v59, %v106_v2  ;;  %v111_v6 = vsub.s32 4294967266, %v106_v2 }
  0x47   :  { %v109_v7 = vshrl.u32 %v91_v0, %v107_v3  ;;  %v112_v8 = vadd.s32 127, %v111_v6 }
  0x49   :  { %v110_v9 = vor.u32 %v109_v7, %v108_v5  ;;  %v113_v10 = vshll.u32 %v112_v8, 23 }
  0x4b   :  { %v114_v11 = vor.u32 4788187, %v113_v10  ;;  %v117_v12 = vcvt.s32.f32 %v110_v9 }
  0x4d   :  { %v115_v13 = vand.u32 2147483647, %v114_v11 }
  0x4f   :  { %v118_v15 = vmul.f32 %v117_v12, %v115_v13 }
  0x51   :  { %v119_v16 = vxor.u32 2147483648, %v118_v15 }
  0x53   :  { %v120_v18 = vsel %vm37_vm7, %v119_v16, %v118_v15 }
  0x54   :  { %v123_v19 = vsel %vm36_vm8, %v428_v1, %v120_v18 }
  0x55   :  { %306 = vcosq.f32 %v123_v19 }
  0x56   :  { %308 = vsinq.f32 %v123_v19 }
  0x5f   :  { %v307_v24 = vpop.eup %306 }
  0x60   :  { %v309_v25 = vpop.eup %308  ;;  %v135_v26 = vxor.u32 2147483648, %v307_v24 }
  0x61   :  { %v132_v4 = vxor.u32 2147483648, %v309_v25 }
  0x62   :  { %v136_v27 = vsel %vm134_vm9, %v135_v26, %v309_v25  ;;  %v239_v28 = vsel %vm237_vm10, %v135_v26, %v309_v25 }
  0x63   :  { %v133_v29 = vsel %vm131_vm11, %v307_v24, %v132_v4  ;;  %v236_v30 = vsel %vm234_vm12, %v307_v24, %v132_v4 }
  0x64   :  { %v137_v34 = vsel %vm130_vm13, %v133_v29, %v136_v27  ;;  %v240_v35 = vsel %vm233_vm14, %v236_v30, %v239_v28 }
  0x65   :  { %v138_v36 = vsel %vm127_vm15, nan, %v137_v34  ;;  %v241_v37 = vsel %vm127_vm15, nan, %v240_v35 }
  0x66   :  { %v244_v1 = vmul.f32 %v242_v31, %v241_v37  ;;  %v245_v38 = vmul.f32 %v243_v32, %v138_v36  ;;  %v252_v39 = vmul.f32 %v243_v32, %v241_v37  ;;  %v253_v40 = vmul.f32 %v242_v31, %v138_v36 }
  0x68   :  { %v246_v41 = vadd.f32 %v245_v38, %v244_v1  ;;  %v254_v42 = vsub.f32 %v252_v39, %v253_v40 }
  0x6a   :  { %251 = vst.msk [vmem:[#allocation5] sm:$0x3] %vm249_vm0, %v246_v41  ;;  %255 = vst.msk [vmem:[#allocation6] sm:$0x3] %vm249_vm0, %v254_v42 }
  0x6b   :  { %343 = shalt.err (!%p340_p12)
}
  0x6c   :  { %s344_s9 = scalar_lea.hbm %s482_s3, 32 }
  0x6d   :  { %p345_p13 = scmp.ne.s32.totalorder %s482_s3, %s344_s9  ;;  %p348_p0 = scmp.lt.u32.totalorder %s344_s9, %s482_s3 }
  0x6f   :  { %p350_p1 = pnand %p348_p0, %p345_p13 }
  0x71   :  { %353 = shalt.err (!%p350_p1)
}
  0x72   :  { %265 = dma.vmem_to_hbm [thread:$0]  %s263_s5, 32, %s482_s3, [#allocation4]  }
  0x73   :  { %s354_s16 = scalar_lea.vmem %s273_s7, 32  ;;  %p359_p3 = scmp.lt.s32.totalorder %s273_s7, %s273_s7 }
  0x74   :  { %p355_p2 = scmp.ne.s32.totalorder %s273_s7, %s354_s16  ;;  %p360_p4 = scmp.lt.s32.totalorder %s354_s16, %s354_s16 }
  0x76   :  { %p361_p5 = por %p360_p4, %p359_p3 }
  0x78   :  { %p362_p6 = pnand %p361_p5, %p355_p2 }
  0x7a   :  { %365 = shalt.err (!%p362_p6)
}
  0x7b   :  { %s366_s19 = scalar_lea.hbm %s483_s4, 32 }
  0x7c   :  { %p367_p7 = scmp.ne.s32.totalorder %s483_s4, %s366_s19  ;;  %p370_p8 = scmp.lt.u32.totalorder %s366_s19, %s483_s4 }
  0x7e   :  { %p372_p9 = pnand %p370_p8, %p367_p7 }
  0x80   :  { %375 = shalt.err (!%p372_p9)
}
  0x81   :  { %275 = dma.vmem_to_hbm [thread:$0]  %s273_s7, 32, %s483_s4, [#allocation7]  }
  0x82   :  { %378 = dma.done.wait [#allocation4], 32  }
  0x83   :  { %379 = vsyncadd [#allocation4], 4294967264 }
  0x84   :  { %380 = dma.done.wait [#allocation7], 32  }
  0x85   :  { %381 = vsyncadd [#allocation7], 4294967264 }
  0x86   :  { %282 = vsyncpa [#allocation3], 1 }
  0x87   :  { %283 = vsyncpa [#allocation4], 1 }
  0x88   :  { %284 = vsyncpa [#allocation7], 1 }

</bundles_post_ra>
